<compile_context>
chip_gen: v5e
topology: v5e:2x2
jax: 0.10.0
libtpu: 0.0.40
codegen_flags: <defaults>
</compile_context>

<pallas_src>
import jax
import jax.numpy as jnp
from jax.experimental import pallas as pl
from jax.experimental.pallas import tpu as pltpu


def _round_up(x, m):
    return ((x + m - 1) // m) * m


def _vmem_limit_bytes():
    """Generation-aware VMEM limit: ~48 MiB on v7x (64 MiB/TC physical),
    ~100 MiB on v5e/v6e (128 MiB physical)."""
    try:
        cap = int(pltpu.get_tpu_info().vmem_capacity_bytes)
    except Exception:
        cap = 64 * 1024 * 1024          # conservative (v7x-safe) fallback
    if cap <= 64 * 1024 * 1024:
        return 48 * 1024 * 1024
    return 100 * 1024 * 1024


def _pick_hidden_tile(hp):
    """Contraction / output tile over the hidden dim: prefer 512/256 (v6e/v7x
    MXU is 256-wide), fall back to 128, or the full dim if it is not 128-aligned."""
    if hp % 128 != 0:
        return hp
    for c in (512, 256, 128):
        if hp % c == 0:
            return c
    return hp


def _choose_tm(bs, tm_req, vmem_fn, budget, *, align):
    """Row tile: as large as requested, clipped to the row count, forced to give
    >=2 grid steps (megacore on v7x) when possible, and shrunk to fit VMEM."""
    bs_al = _round_up(bs, align)
    tm = min(_round_up(tm_req, align), bs_al)
    if pl.cdiv(bs, tm) < 2 and bs > align:          # both v7x TensorCores get work
        tm = _round_up(pl.cdiv(bs, 2), align)
    while tm > align and vmem_fn(tm) > budget:
        tm = max(align, _round_up(tm // 2, align))
    return tm


# ---------------------------------------------------------------------------
# Fused kernel: base-model epilogue (dense + bias + tanh) + ValueHead matvec
# + per-row mask.  The hidden state never round-trips HBM; the dense weight is
# streamed in (tk, tn) tiles so resident VMEM stays bounded at large H.
# ---------------------------------------------------------------------------
def _fused_epilogue_value_head_kernel(emb_ref, wh_ref, bh_ref, mask_ref,
                                      wpad_ref, vb_ref, o_ref,
                                      acc_h_ref, acc_v_ref):
    # emb_ref  : (TM, TK)  bf16  -- streamed row/contraction tile of embeddings
    # wh_ref   : (TK, TN)  bf16  -- dense weight tile
    # bh_ref   : (1,  TN)  f32   -- dense bias tile
    # mask_ref : (TM, 1)   f32   -- attention mask rows
    # wpad_ref : (TN, 128) bf16  -- ValueHead weight rows, zero-padded to 128 lanes
    # vb_ref   : (1, 1)    f32   -- ValueHead bias (SMEM scalar)
    # o_ref    : (TM, 128) f32   -- lane-dense output; column 0 is the value
    # acc_h_ref: (TM, TN)  f32   -- dense accumulator over k
    # acc_v_ref: (TM, 128) f32   -- value-head accumulator over n
    n = pl.program_id(1)
    k = pl.program_id(2)
    n_last = pl.num_programs(1) - 1
    k_last = pl.num_programs(2) - 1

    @pl.when(jnp.logical_and(n == 0, k == 0))
    def _():
        acc_v_ref[...] = jnp.zeros_like(acc_v_ref)

    @pl.when(k == 0)
    def _():
        acc_h_ref[...] = jnp.zeros_like(acc_h_ref)

    acc_h_ref[...] += jnp.dot(emb_ref[...], wh_ref[...],
                              preferred_element_type=jnp.float32)

    @pl.when(k == k_last)
    def _():
        h = jnp.tanh(acc_h_ref[...] + bh_ref[...])               # (TM, TN) f32
        # dropout(0.1) is identity in eval mode.
        acc_v_ref[...] += jnp.dot(h.astype(jnp.bfloat16), wpad_ref[...],
                                  preferred_element_type=jnp.float32)

    @pl.when(jnp.logical_and(n == n_last, k == k_last))
    def _():
        # mask is a per-row scalar -> commutes with the right-matmul; applying it
        # here is H/128x fewer VALU ops than masking the (TM, H) hidden slab.
        o_ref[...] = acc_v_ref[...] * mask_ref[...] + vb_ref[0, 0]


def _fused_vmem_bytes(tm, tk, tn):
    stream = 2 * tm * tk * 2            # emb tiles (bf16, double-buffered)
    stream += 2 * tk * tn * 2           # wh tiles (bf16)
    stream += 2 * 1 * tn * 4            # bh tiles (f32)
    stream += 2 * tn * 128 * 2          # value-head weight slab (bf16)
    stream += 2 * tm * 128 * 4          # mask rows (f32, lane-padded estimate)
    stream += 2 * tm * 128 * 4          # output tiles (f32)
    scratch = tm * tn * 4 + tm * 128 * 4
    return stream + scratch


def fused_epilogue_value_head(emb, attention_mask, wh, bh, w_pad, vb, *,
                              tm_req=1024):
    """emb: (B,S,Hp) bf16 (Hp multiple of 128 from prepare_params),
    attention_mask: (B,S), wh: (Hp,Hp) bf16, bh: (1,Hp) f32,
    w_pad: (Hp,128) bf16, vb: (1,1) f32.  Returns value: (B,S) f32."""
    B, S, Hp = emb.shape
    BS = B * S

    emb2d = emb.reshape(BS, Hp)
    mask2d = attention_mask.reshape(BS, 1).astype(jnp.float32)

    tk = _pick_hidden_tile(Hp)
    tn = _pick_hidden_tile(Hp)
    limit = _vmem_limit_bytes()
    align = 256 if BS >= 512 else 8      # 256-row tiles feed the v6e/v7x MXU fully
    tm = _choose_tm(BS, tm_req, lambda t: _fused_vmem_bytes(t, tk, tn),
                    int(0.9 * limit), align=align)

    out = pl.pallas_call(
        _fused_epilogue_value_head_kernel,
        out_shape=jax.ShapeDtypeStruct((BS, 128), jnp.float32),
        grid_spec=pltpu.PrefetchScalarGridSpec(
            num_scalar_prefetch=0,
            grid=(pl.cdiv(BS, tm), Hp // tn, Hp // tk),
            in_specs=[
                pl.BlockSpec((tm, tk), lambda i, n, k: (i, k)),   # emb rows
                pl.BlockSpec((tk, tn), lambda i, n, k: (k, n)),   # wh tile
                pl.BlockSpec((1, tn), lambda i, n, k: (0, n)),    # bh tile
                pl.BlockSpec((tm, 1), lambda i, n, k: (i, 0)),    # mask rows
                pl.BlockSpec((tn, 128), lambda i, n, k: (n, 0)),  # value-head w
                pl.BlockSpec(memory_space=pltpu.MemorySpace.SMEM),  # value-head b
            ],
            out_specs=pl.BlockSpec((tm, 128), lambda i, n, k: (i, 0)),
            scratch_shapes=[pltpu.VMEM((tm, tn), jnp.float32),
                            pltpu.VMEM((tm, 128), jnp.float32)],
        ),
        compiler_params=pltpu.CompilerParams(
            dimension_semantics=("parallel", "arbitrary", "arbitrary"),
            vmem_limit_bytes=limit),
    )(emb2d, wh, bh, mask2d, w_pad, vb)
    return out[:, 0].reshape(B, S)                          # == .squeeze(-1)


# ---------------------------------------------------------------------------
# Standalone ValueHead kernel (hidden states arriving from an external LM):
# stream native dtype (no wrapper cast pass), narrow to bf16 in-kernel, MXU
# matvec against a lane-padded (H, 128) bf16 weight slab.
# ---------------------------------------------------------------------------
def _value_head_kernel(h_ref, w_ref, b_ref, o_ref):
    # h_ref: (TM, H) native dtype, w_ref: (H, 128) bf16, b_ref: (1,1) SMEM f32
    # o_ref: (TM, 128) f32 lane-dense; column 0 is the value.
    h = h_ref[...].astype(jnp.bfloat16)      # dropout = identity in eval mode
    o_ref[...] = jnp.dot(h, w_ref[...],
                         preferred_element_type=jnp.float32) + b_ref[0, 0]


def value_head_pallas(hidden_states, weight, bias, *, tm_req=1024):
    """hidden_states: (B,S,H) (any float dtype), weight: (1,H), bias: (1,1)
    -> value: (B,S) f32."""
    B, S, H = hidden_states.shape
    BS = B * S
    h2d = hidden_states.reshape(BS, H)       # native dtype on the wire
    w_pad = jnp.zeros((H, 128), jnp.bfloat16).at[:, 0].set(
        weight[0].astype(jnp.bfloat16))
    b = bias.reshape(1, 1).astype(jnp.float32)

    itemsize = jnp.dtype(h2d.dtype).itemsize
    limit = _vmem_limit_bytes()
    align = 256 if BS >= 512 else 8

    def vmem_fn(t):
        return (2 * t * H * itemsize         # hidden stream (double-buffered)
                + 2 * H * 128 * 2            # weight slab
                + 2 * t * 128 * 4            # output tiles
                + t * H * 2)                 # in-kernel bf16 temp

    tm = _choose_tm(BS, tm_req, vmem_fn, int(0.9 * limit), align=align)

    out = pl.pallas_call(
        _value_head_kernel,
        out_shape=jax.ShapeDtypeStruct((BS, 128), jnp.float32),
        grid=(pl.cdiv(BS, tm),),
        in_specs=[
            pl.BlockSpec((tm, H), lambda i: (i, 0)),
            pl.BlockSpec((H, 128), lambda i: (0, 0)),
            pl.BlockSpec(memory_space=pltpu.MemorySpace.SMEM),
        ],
        out_specs=pl.BlockSpec((tm, 128), lambda i: (i, 0)),
        compiler_params=pltpu.CompilerParams(
            dimension_semantics=("parallel",),
            vmem_limit_bytes=limit),
    )(h2d, w_pad, b)
    return out[:, 0].reshape(B, S)


# ---------------------------------------------------------------------------
# One-time parameter preparation (hoisted out of the per-step forward):
# cast to bf16 once, pad the hidden dim up to a multiple of 128 lanes.
# ---------------------------------------------------------------------------
def prepare_params(raw):
    H = raw["wh"].shape[0]
    Hp = max(_round_up(H, 128), 128)
    pad = Hp - H

    embed = raw["embed"].astype(jnp.bfloat16)
    wh = raw["wh"].astype(jnp.bfloat16)
    bh = raw["bh"].astype(jnp.float32).reshape(1, H)
    if pad:
        embed = jnp.pad(embed, ((0, 0), (0, pad)))
        wh = jnp.pad(wh, ((0, pad), (0, pad)))
        bh = jnp.pad(bh, ((0, 0), (0, pad)))
    w_pad = jnp.zeros((Hp, 128), jnp.bfloat16).at[:H, 0].set(
        raw["v_head_w"][0].astype(jnp.bfloat16))
    vb = raw["v_head_b"].reshape(1, 1).astype(jnp.float32)
    return {"embed": embed, "wh": wh, "bh": bh, "w_pad": w_pad, "vb": vb}


# ---------------------------------------------------------------------------
# Full RewardModelWithValueHead.forward equivalent.
# ---------------------------------------------------------------------------
def reward_model_forward(input_ids, attention_mask, params):
    # Embedding gather stays in plain JAX (the real module delegates the whole
    # LM to an external HF model); everything downstream is one fused kernel,
    # so the (B,S,H) hidden slab never round-trips HBM.
    # TODO(synk): embedding gather / full pretrained LM not expressed in Pallas.
    emb = params["embed"][input_ids]                          # (B,S,Hp) bf16
    return fused_epilogue_value_head(
        emb, attention_mask,
        params["wh"], params["bh"], params["w_pad"], params["vb"])


if __name__ == "__main__":
    B, S, H, VOCAB = 2, 8, 32, 100

    key = jax.random.PRNGKey(0)
    k_emb, k_wh, k_vw, k_ids = jax.random.split(key, 4)

    raw_params = {
        "embed": jax.random.normal(k_emb, (VOCAB, H), jnp.float32) * 0.02,
        "wh":    jax.random.normal(k_wh, (H, H), jnp.float32) * 0.02,
        "bh":    jnp.zeros((H,), jnp.float32),
        # ValueHead init: weight ~ N(mean=5e-7, std=1e-6), bias = 1e-6
        "v_head_w": (jax.random.normal(k_vw, (1, H), jnp.float32) * 1e-6 + 5e-7),
        "v_head_b": jnp.full((1, 1), 1e-6, jnp.float32),
    }
    params = prepare_params(raw_params)       # one-time bf16 cast + lane padding

    input_ids = jax.random.randint(k_ids, (B, S), 0, VOCAB, dtype=jnp.int32)
    attention_mask = jnp.ones((B, S), jnp.int32).at[1, 6:].set(0)

    fwd = jax.jit(reward_model_forward)
    value = jax.block_until_ready(fwd(input_ids, attention_mask, params))
    assert value.shape == (B, S)

    # Plain-JAX reference mirroring the kernel precision path (bf16 streams,
    # f32 accumulation, bf16 value matvec, mask applied after the matvec).
    emb_bf = params["embed"][input_ids]                            # (B,S,Hp) bf16
    h = jnp.tanh(jnp.dot(emb_bf, params["wh"],
                         preferred_element_type=jnp.float32) + params["bh"][0])
    h_bf = h.astype(jnp.bfloat16).astype(jnp.float32)
    w_f = params["w_pad"][:, 0].astype(jnp.float32)
    ref = (jnp.einsum("bsh,h->bs", h_bf, w_f)
           * attention_mask.astype(jnp.float32) + params["vb"][0, 0])
    assert jnp.allclose(value, ref, rtol=1e-3, atol=1e-8)

    # Standalone ValueHead kernel check (native-dtype hidden states from HBM).
    emb32 = raw_params["embed"].astype(jnp.bfloat16)[input_ids]
    h32 = jnp.tanh(jnp.dot(emb32, raw_params["wh"].astype(jnp.bfloat16),
                           preferred_element_type=jnp.float32) + raw_params["bh"])
    h32 = h32 * attention_mask[..., None].astype(jnp.float32)     # (B,S,H) f32
    v_only = jax.block_until_ready(
        value_head_pallas(h32, raw_params["v_head_w"], raw_params["v_head_b"]))
    h32_bf = h32.astype(jnp.bfloat16).astype(jnp.float32)
    w_bf = raw_params["v_head_w"][0].astype(jnp.bfloat16).astype(jnp.float32)
    ref2 = jnp.einsum("bsh,h->bs", h32_bf, w_bf) + raw_params["v_head_b"][0, 0]
    assert v_only.shape == (B, S)
    assert jnp.allclose(v_only, ref2, rtol=1e-3, atol=1e-8)

    # TODO(synk): training-mode dropout (nn.Dropout(0.1) with 1/(1-p) scaling)
    # not implemented; kernels reproduce eval/inference semantics.
    print("KERNEL_OK")
</pallas_src>

<mosaic_0001>
module attributes {stable_mosaic.version = 11 : i64} {
  func.func @_fused_epilogue_value_head_kernel(%arg0: i32, %arg1: i32, %arg2: i32, %arg3: memref<8x128xbf16, #tpu.memory_space<vmem>>, %arg4: memref<128x128xbf16, #tpu.memory_space<vmem>>, %arg5: memref<1x128xf32, #tpu.memory_space<vmem>>, %arg6: memref<8x1xf32, #tpu.memory_space<vmem>>, %arg7: memref<128x128xbf16, #tpu.memory_space<vmem>>, %arg8: memref<1x1xf32, #tpu.memory_space<smem>>, %arg9: memref<8x128xf32, #tpu.memory_space<vmem>>, %arg10: memref<8x128xf32, #tpu.memory_space<vmem>>, %arg11: memref<8x128xf32, #tpu.memory_space<vmem>>) attributes {dimension_semantics = [#tpu.dimension_semantics<parallel>, #tpu.dimension_semantics<arbitrary>, #tpu.dimension_semantics<arbitrary>], iteration_bounds = array<i64: 2, 1, 1>, scalar_prefetch = 0 : i64, scratch_operands = 2 : i64, tpu.core_type = #tpu.core_type<tc>, window_params = [{transform_indices = @transform_0, window_bounds = array<i64: 8, 128>}, {transform_indices = @transform_1, window_bounds = array<i64: 128, 128>}, {transform_indices = @transform_2, window_bounds = array<i64: 1, 128>}, {transform_indices = @transform_3, window_bounds = array<i64: 8, 1>}, {transform_indices = @transform_4, window_bounds = array<i64: 128, 128>}, {transform_indices = @transform_5, window_bounds = array<i64: 1, 1>}, {transform_indices = @transform_6, window_bounds = array<i64: 8, 128>}]} {
    %c0_i32 = arith.constant 0 : i32
    %0 = arith.cmpi eq, %arg1, %c0_i32 : i32
    %c0_i32_0 = arith.constant 0 : i32
    %1 = arith.cmpi eq, %arg2, %c0_i32_0 : i32
    %2 = arith.andi %0, %1 : i1
    %3 = arith.extui %2 : i1 to i32
    %c0_i32_1 = arith.constant 0 : i32
    %4 = arith.cmpi ne, %3, %c0_i32_1 : i32
    scf.if %4 {
      %cst_16 = arith.constant 0.000000e+00 : f32
      %22 = vector.broadcast %cst_16 : f32 to vector<8x128xf32>
      %c0_17 = arith.constant 0 : index
      %c0_18 = arith.constant 0 : index
      %23 = vector.load %arg11[%c0_17, %c0_18] : memref<8x128xf32, #tpu.memory_space<vmem>>, vector<8x128xf32>
      tpu.vector_store %arg11[%c0_17, %c0_18], %22 {strides = array<i32>} : memref<8x128xf32, #tpu.memory_space<vmem>>, vector<8x128xf32>,
    } else {
    }
    %c0_i32_2 = arith.constant 0 : i32
    %5 = arith.cmpi eq, %arg2, %c0_i32_2 : i32
    %6 = arith.extui %5 : i1 to i32
    %c0_i32_3 = arith.constant 0 : i32
    %7 = arith.cmpi ne, %6, %c0_i32_3 : i32
    scf.if %7 {
      %cst_16 = arith.constant 0.000000e+00 : f32
      %22 = vector.broadcast %cst_16 : f32 to vector<8x128xf32>
      %c0_17 = arith.constant 0 : index
      %c0_18 = arith.constant 0 : index
      %23 = vector.load %arg10[%c0_17, %c0_18] : memref<8x128xf32, #tpu.memory_space<vmem>>, vector<8x128xf32>
      tpu.vector_store %arg10[%c0_17, %c0_18], %22 {strides = array<i32>} : memref<8x128xf32, #tpu.memory_space<vmem>>, vector<8x128xf32>,
    } else {
    }
    %c0 = arith.constant 0 : index
    %c0_4 = arith.constant 0 : index
    %8 = vector.load %arg10[%c0, %c0_4] : memref<8x128xf32, #tpu.memory_space<vmem>>, vector<8x128xf32>
    %c0_5 = arith.constant 0 : index
    %c0_6 = arith.constant 0 : index
    %9 = vector.load %arg3[%c0_5, %c0_6] : memref<8x128xbf16, #tpu.memory_space<vmem>>, vector<8x128xbf16>
    %c0_7 = arith.constant 0 : index
    %c0_8 = arith.constant 0 : index
    %10 = vector.load %arg4[%c0_7, %c0_8] : memref<128x128xbf16, #tpu.memory_space<vmem>>, vector<128x128xbf16>
    %cst = arith.constant dense<0.000000e+00> : vector<8x128xf32>
    %11 = tpu.matmul %9, %10, %cst {dimension_numbers = #tpu.dot_dimension_numbers<[1], [0], [0], [1], [0, 0, 1, 1], [], []>} : vector<8x128xbf16>, vector<128x128xbf16>, vector<8x128xf32> -> vector<8x128xf32>
    %12 = arith.addf %8, %11 : vector<8x128xf32>
    %c0_9 = arith.constant 0 : index
    %c0_10 = arith.constant 0 : index
    %13 = vector.load %arg10[%c0_9, %c0_10] : memref<8x128xf32, #tpu.memory_space<vmem>>, vector<8x128xf32>
    tpu.vector_store %arg10[%c0_9, %c0_10], %12 {strides = array<i32>} : memref<8x128xf32, #tpu.memory_space<vmem>>, vector<8x128xf32>,
    %c0_i32_11 = arith.constant 0 : i32
    %14 = arith.cmpi eq, %arg2, %c0_i32_11 : i32
    %15 = arith.extui %14 : i1 to i32
    %c0_i32_12 = arith.constant 0 : i32
    %16 = arith.cmpi ne, %15, %c0_i32_12 : i32
    scf.if %16 {
      %c0_16 = arith.constant 0 : index
      %c0_17 = arith.constant 0 : index
      %22 = vector.load %arg10[%c0_16, %c0_17] : memref<8x128xf32, #tpu.memory_space<vmem>>, vector<8x128xf32>
      %c0_18 = arith.constant 0 : index
      %c0_19 = arith.constant 0 : index
      %23 = vector.load %arg5[%c0_18, %c0_19] : memref<1x128xf32, #tpu.memory_space<vmem>>, vector<1x128xf32>
      %24 = vector.broadcast %23 : vector<1x128xf32> to vector<8x128xf32>
      %25 = arith.addf %22, %24 : vector<8x128xf32>
      %26 = math.tanh %25 : vector<8x128xf32>
      %c0_20 = arith.constant 0 : index
      %c0_21 = arith.constant 0 : index
      %27 = vector.load %arg11[%c0_20, %c0_21] : memref<8x128xf32, #tpu.memory_space<vmem>>, vector<8x128xf32>
      %28 = arith.truncf %26 : vector<8x128xf32> to vector<8x128xbf16>
      %c0_22 = arith.constant 0 : index
      %c0_23 = arith.constant 0 : index
      %29 = vector.load %arg7[%c0_22, %c0_23] : memref<128x128xbf16, #tpu.memory_space<vmem>>, vector<128x128xbf16>
      %cst_24 = arith.constant dense<0.000000e+00> : vector<8x128xf32>
      %30 = tpu.matmul %28, %29, %cst_24 {dimension_numbers = #tpu.dot_dimension_numbers<[1], [0], [0], [1], [0, 0, 1, 1], [], []>} : vector<8x128xbf16>, vector<128x128xbf16>, vector<8x128xf32> -> vector<8x128xf32>
      %31 = arith.addf %27, %30 : vector<8x128xf32>
      %c0_25 = arith.constant 0 : index
      %c0_26 = arith.constant 0 : index
      %32 = vector.load %arg11[%c0_25, %c0_26] : memref<8x128xf32, #tpu.memory_space<vmem>>, vector<8x128xf32>
      tpu.vector_store %arg11[%c0_25, %c0_26], %31 {strides = array<i32>} : memref<8x128xf32, #tpu.memory_space<vmem>>, vector<8x128xf32>,
    } else {
    }
    %c0_i32_13 = arith.constant 0 : i32
    %17 = arith.cmpi eq, %arg1, %c0_i32_13 : i32
    %c0_i32_14 = arith.constant 0 : i32
    %18 = arith.cmpi eq, %arg2, %c0_i32_14 : i32
    %19 = arith.andi %17, %18 : i1
    %20 = arith.extui %19 : i1 to i32
    %c0_i32_15 = arith.constant 0 : i32
    %21 = arith.cmpi ne, %20, %c0_i32_15 : i32
    scf.if %21 {
      %c0_16 = arith.constant 0 : index
      %c0_17 = arith.constant 0 : index
      %22 = vector.load %arg11[%c0_16, %c0_17] : memref<8x128xf32, #tpu.memory_space<vmem>>, vector<8x128xf32>
      %c0_18 = arith.constant 0 : index
      %c0_19 = arith.constant 0 : index
      %23 = vector.load %arg6[%c0_18, %c0_19] : memref<8x1xf32, #tpu.memory_space<vmem>>, vector<8x1xf32>
      %24 = vector.broadcast %23 : vector<8x1xf32> to vector<8x128xf32>
      %25 = arith.mulf %22, %24 : vector<8x128xf32>
      %c0_20 = arith.constant 0 : index
      %c0_21 = arith.constant 0 : index
      %26 = memref.load %arg8[%c0_20, %c0_21] : memref<1x1xf32, #tpu.memory_space<smem>>
      %27 = vector.broadcast %26 : f32 to vector<8x128xf32>
      %28 = arith.addf %25, %27 : vector<8x128xf32>
      %c0_22 = arith.constant 0 : index
      %c0_23 = arith.constant 0 : index
      %29 = vector.load %arg9[%c0_22, %c0_23] : memref<8x128xf32, #tpu.memory_space<vmem>>, vector<8x128xf32>
      tpu.vector_store %arg9[%c0_22, %c0_23], %28 {strides = array<i32>} : memref<8x128xf32, #tpu.memory_space<vmem>>, vector<8x128xf32>,
    } else {
    }
    return
  }
  func.func @transform_0(%arg0: i32, %arg1: i32, %arg2: i32) -> (i32, i32) {
    %c0_i32 = arith.constant 0 : i32
    return %arg0, %arg2 : i32, i32
  }
  func.func @transform_1(%arg0: i32, %arg1: i32, %arg2: i32) -> (i32, i32) {
    %c0_i32 = arith.constant 0 : i32
    return %arg2, %arg1 : i32, i32
  }
  func.func @transform_2(%arg0: i32, %arg1: i32, %arg2: i32) -> (i32, i32) {
    %c0_i32 = arith.constant 0 : i32
    %c0_i32_0 = arith.constant 0 : i32
    return %c0_i32, %arg1 : i32, i32
  }
  func.func @transform_3(%arg0: i32, %arg1: i32, %arg2: i32) -> (i32, i32) {
    %c0_i32 = arith.constant 0 : i32
    %c0_i32_0 = arith.constant 0 : i32
    return %arg0, %c0_i32 : i32, i32
  }
  func.func @transform_4(%arg0: i32, %arg1: i32, %arg2: i32) -> (i32, i32) {
    %c0_i32 = arith.constant 0 : i32
    %c0_i32_0 = arith.constant 0 : i32
    return %arg1, %c0_i32 : i32, i32
  }
  func.func @transform_5(%arg0: i32, %arg1: i32, %arg2: i32) -> (i32, i32) {
    %c0_i32 = arith.constant 0 : i32
    %c0_i32_0 = arith.constant 0 : i32
    %c0_i32_1 = arith.constant 0 : i32
    return %c0_i32, %c0_i32_0 : i32, i32
  }
  func.func @transform_6(%arg0: i32, %arg1: i32, %arg2: i32) -> (i32, i32) {
    %c0_i32 = arith.constant 0 : i32
    %c0_i32_0 = arith.constant 0 : i32
    return %arg0, %c0_i32 : i32, i32
  }
}

</mosaic_0001>

<bundles_post_ra>
// kernel: squeeze.1
= control target key start
LH: loop header
LB: loop body
LE: loop exit
PB: predicated region body
PF: predicated region fallthrough
CT: control target
= control target key end

     0   :  { %s80_s0 = inlined_call_operand.vmem [shape: f32[16], index: 0, kind: input, shape index: {}]   ;;  %s81_s1 = inlined_call_operand.hbm [shape: f32[2,8], index: 1, kind: output, shape index: {}]  }
   0x1   :  { %v5_v0 = vld [vmem:[%s80_s0] sm:$0x1] }
   0x2   :  { %2 = vsyncpa [#allocation1], 0  ;;  %6 = vst [vmem:[#allocation3] sm:$0x1] %v5_v0  ;;  %vm8_vm0 = vcmask 64512   ;;  %s62_s0 = smov 120  }
   0x3   :  { %s63_s8 = smov [#allocation0]   ;;  %s27_s1 = sshll.u32 %s81_s1, 4  ;;  %s28_s1 = int_to_ptr.hbm [resolvable:$true] %s27_s1 }
   0x4   :  { %s25_s9 = sshll.u32 %s63_s8, 4  ;;  %s26_s9 = int_to_ptr.vmem [resolvable:$true] %s25_s9 }
   0x9   :  { %v10_v1 = vld [vmem:[#allocation3] sm:$0x1]  }
   0xa   :  { %v7_v2 = vld [vmem:[#allocation3] sm:$0x1]   ;;  %11 = vrot.lane.b32.xlu0 %v10_v1, %s62_s0 }
   0xb   :  { %9 = vst.msk [vmem:[#allocation2] sm:$0x1] %vm8_vm0, %v7_v2  }
  0x7c   :  { %v12_v3 = vpop.permute.xlu0 %11  }
  0x7d   :  { %15 = vst.msk [vmem:[#allocation2 + $0x1] sm:$0x1] %vm8_vm0, %v12_v3  }
  0x84   :  { %v18_v4 = vld [vmem:[#allocation2] sm:$0x3] }
  0x85   :  { %21 = vst [vmem:[#allocation0] sm:$0x3] %v18_v4 }
  0x86   :  { %30 = dma.vmem_to_hbm [thread:$0]  %s26_s9, 32, %s28_s1, [#allocation1]  }
  0x87   :  { %60 = dma.done.wait [#allocation1], 32  }
  0x88   :  { %61 = vsyncadd [#allocation1], 4294967264 }
  0x89   :  { %33 = vsyncpa [#allocation1], 1 }

// kernel: reward_model_forward.1
= control target key start
LH: loop header
LB: loop body
LE: loop exit
PB: predicated region body
PF: predicated region fallthrough
CT: control target
= control target key end

     0   :  { %s1000_s0 = inlined_call_operand.vmem [shape: bf16[16,128], index: 0, kind: input, shape index: {}]   ;;  %s1001_s1 = inlined_call_operand.vmem [shape: bf16[128,128], index: 1, kind: input, shape index: {}]   ;;  %s1002_s2 = inlined_call_operand.vmem [shape: f32[1,128], index: 2, kind: input, shape index: {}]   ;;  %s1003_s3 = inlined_call_operand.vmem [shape: f32[16,1], index: 3, kind: input, shape index: {}]   ;;  %s1004_s4 = inlined_call_operand.hbm [shape: bf16[128,128], index: 4, kind: input, shape index: {}]   ;;  %s1005_s5 = inlined_call_operand.<no memory space> [shape: f32[1,1], index: 5, kind: input, shape index: {}]   ;;  %s1006_s6 = inlined_call_operand.vmem [shape: f32[16,128], index: 6, kind: output, shape index: {}]  }
   0x1   :  { %11 = sst [smem:[#allocation4]] %s1005_s5 }
   0x2   :  { %12 = vsyncpa [#allocation6], 0  ;;  %s925_s23 = smov 0   ;;  %s927_s24 = smov 0  }
   0x3   :  { %s929_s25 = smov 0  }
   0x4 LB: > { %s689_s5 = sadd.s32 4294967295, %s881_s25   ;;  %s37_s26 = sadd.s32 1, %s877_s24  ;;  %s881_s25 = sphi %s929_s25, %s18_s25   ;;  %s877_s24 = sphi %s927_s24, %s1008_s24   ;;  %s873_s23 = sphi %s925_s23, %s1007_s23  }
   0x5   : > { %p39_p0 = scmp.ge.s32.totalorder %s37_s26, 2  ;;  %p691_p1 = scmp.ge.s32.totalorder %s881_s25, 1 }
   0x6   : > { %p223_p2 = scmp.lt.s32.totalorder %s881_s25, 3  ;;  %p791_p4 = scmp.eq.s32.totalorder %s689_s5, 0 }
   0x7   : > { %s1010_s26 = smov (%p39_p0, %s37_s26), 0  ;;  %s255_s29 = sshll.u32 %s1004_s4, 4  ;;  %s256_s29 = int_to_ptr.hbm [resolvable:$true] %s255_s29 }
   0x8   : > { %p224_p3 = pnand %p691_p1, %p223_p2  ;;  %s883_s30 = smov [#allocation5]  }
   0x9   : > { %s257_s7 = sshll.u32 %s883_s30, 4  ;;  %s884_s8 = smov 64   ;;  %s258_s7 = int_to_ptr.vmem [resolvable:$true] %s257_s7 }
   0xa   : > { %p787_p5 = pneg %p224_p3  ;;  %s885_s9 = smov 4  }
   0xb   : > { %293 = sbr.rel (%p224_p3) target bundleno = 320 (0x140), region = 44 }
   0xc   : > { %p788_p6 = pnand %p791_p4, %p787_p5 }
   0xe   : > { %790 = dma.hbm_to_vmem [thread:$0]  (!%p788_p6), %s256_s29, 1024, %s258_s7, [#allocation6], %s884_s8, %s884_s8, %s885_s9  }
  0x10   : > { %868 = dma.done.wait (%p791_p4), [#allocation6], 1024  }
  0x11   : > { %870 = vsyncadd (%p791_p4), [#allocation6], 4294966272  ;;  %v774_v0 = vld [vmem:[%s1001_s1 + $0x38] sm:$0xff]  ;;  %v773_v1 = vld [vmem:[%s1001_s1 + $0x30] sm:$0xff]  ;;  %p340_p7 = scmp.lt.s32.totalorder %s873_s23, 1  ;;  %v886_v18 = vmov 0  }
  0x12   : > { %445 = vmatpush.bf16.msra.mxu0 %v774_v0  ;;  %v782_v2 = vld [vmem:[#allocation5 + $0x38] sm:$0xff]  ;;  %v781_v3 = vld [vmem:[#allocation5 + $0x30] sm:$0xff]  ;;  %v772_v4 = vld [vmem:[%s1001_s1 + $0x28] sm:$0xff]  ;;  %821 = vset.pattern.permute.xlu0 %v886_v18 }
  0x13   : > { %536 = vmatpush.bf16.msra.mxu1 %v782_v2  ;;  %v780_v5 = vld [vmem:[#allocation5 + $0x28] sm:$0xff]  ;;  %v771_v6 = vld [vmem:[%s1001_s1 + $0x20] sm:$0xff]  ;;  %v770_v8 = vld [vmem:[%s1001_s1 + $0x18] sm:$0xff]  ;;  %s1012_s23 = smov (!%p340_p7, %s873_s23), 1 }
  0x14   : > { %v779_v7 = vld [vmem:[#allocation5 + $0x20] sm:$0xff]  ;;  %v778_v9 = vld [vmem:[#allocation5 + $0x18] sm:$0xff]  ;;  %v769_v10 = vld [vmem:[%s1001_s1 + $0x10] sm:$0xff]  ;;  %s698_s27 = sshll.u32 %s1012_s23, 2  ;;  %s699_s9 = sshll.u32 %s1012_s23, 3 }
  0x15   : > { %v768_v11 = vld [vmem:[%s1001_s1 + $0x8] sm:$0xff]  ;;  %v767_v12 = vld [vmem:[%s1001_s1] sm:$0xff]  ;;  %s346_s8 = scalar_lea.vmem %s1000_s0, %s698_s27  ;;  %v777_v14 = vld [vmem:[#allocation5 + $0x10] sm:$0xff]  ;;  %s362_s12 = scalar_lea.vmem %s1003_s3, %s699_s9 }
  0x16   : > { %446 = vmatpush.bf16.msra.mxu0 %v773_v1  ;;  %v380_v13 = vld [vmem:[%s346_s8] sm:$0xf]  ;;  %v776_v15 = vld [vmem:[#allocation5 + $0x8] sm:$0xff]  ;;  %s561_s23 = sld [smem:[#allocation4]]  ;;  %s367_s17 = scalar_lea.vmem %s1006_s6, %s699_s9 }
  0x17   : > { %537 = vmatpush.bf16.msra.mxu1 %v781_v3  ;;  %v775_v16 = vld [vmem:[#allocation5] sm:$0xff] }
  0x18   : > { %v554_v17 = vld [vmem:[%s362_s12] sm:$0xff] }
  0x19   : > { %557 = vperm.xlu0 %821, %v554_v17   ;;  %v822_v19 = vld [vmem:[%s1002_s2] ss:$0 sm:$0xff] }
  0x1a   : > { %447 = vmatpush.bf16.msra.mxu0 %v772_v4 }
  0x1b   : > { %538 = vmatpush.bf16.msra.mxu1 %v780_v5 }
  0x1c   : > { %v562_v27 = vstv %s561_s23 }
  0x1e   : > { %448 = vmatpush.bf16.msra.mxu0 %v771_v6 }
  0x1f   : > { %539 = vmatpush.bf16.msra.mxu1 %v779_v7 }
  0x22   : > { %449 = vmatpush.bf16.msra.mxu0 %v770_v8 }
  0x23   : > { %540 = vmatpush.bf16.msra.mxu1 %v778_v9 }
  0x26   : > { %450 = vmatpush.bf16.msra.mxu0 %v769_v10 }
  0x27   : > { %541 = vmatpush.bf16.msra.mxu1 %v777_v14 }
  0x2a   : > { %451 = vmatpush.bf16.msra.mxu0 %v768_v11 }
  0x2b   : > { %542 = vmatpush.bf16.msra.mxu1 %v776_v15 }
  0x2e   : > { %452 = vmatpush.bf16.msra.mxu0 %v767_v12 }
  0x2f   : > { %543 = vmatpush.bf16.msra.mxu1 %v775_v16 }
  0x31   : > { %453 = vmatmul.bf16.vlgmr.msra.gmra.mxu0 %v380_v13 }
  0x8b   : > { %v558_v25 = vpop.permute.xlu0 %557 }
  0xae   : > { %v454_v20 = vpop.f32.mrf.mxu0 }
  0xaf   : > { %v468_v21 = vadd.f32 %v822_v19, %v454_v20 }
  0xb1   : > { %823 = vtanh.f32 %v468_v21 }
  0xb6   : > { %v456_v22 = vpop.f32.mrf.mxu0 }
  0xb7   : > { %v824_v23 = vpop.eup %823 }
  0xb8   : > { %v471_v24 = vpack.c.bf16 %v824_v23, %v824_v23 }
  0xba   : > { %544 = vmatmul.bf16.vlgmr.msra.gmra.mxu1 %v471_v24 }
 0x137   : > { %v545_v26 = vpop.f32.mrf.mxu1 }
 0x138   : > { %v560_v28 = vmul.f32 %v558_v25, %v545_v26 }
 0x13a   : > { %v563_v29 = vadd.f32 %v562_v27, %v560_v28 }
 0x13c   : > { %564 = vst [vmem:[%s367_s17] sm:$0xff] %v563_v29 }
 0x13f   : > { %v547_v30 = vpop.f32.mrf.mxu1 }
 0x140 PF: > { %s18_s25 = sadd.s32 1, %s881_s25   ;;  %s1007_s23 = smov %s877_s24 }
 0x141   : > { %p15_p8 = scmp.ge.s32.totalorder %s18_s25, 4   ;;  %s1008_s24 = smov %s1010_s26 }
 0x143   :  { %17 = sbr.rel (!%p15_p8) target bundleno = 4 (0x4), region = 105 }
 0x148   :  { %584 = vsyncpa [#allocation6], 1 }
 0x149   :  { %586 = vsyncpa [#allocation6 + $0x1], 1 }

</bundles_post_ra>
